<compile_context>
chip_gen: v5e
topology: v5e:2x2
jax: 0.10.0
libtpu: 0.0.40
codegen_flags: <defaults>
</compile_context>

<pallas_src>
import jax
import jax.numpy as jnp
from jax.experimental import pallas as pl
from jax.experimental.pallas import tpu as pltpu


_LANE = 128
_MAX_COLS = 4096                        # block col width cap
_TARGET_BLOCK_BYTES = 4 * 1024 * 1024   # ~4 MiB blocks (16 MiB live buffers)
_VMEM_LIMIT_BYTES = 32 * 1024 * 1024    # explicit limit: safe on v5e/v6e/v7x
_MIN_PALLAS_BYTES = 1 * 1024 * 1024     # below this, launch overhead dominates


def _copy_kernel(x_ref, o_ref):
    # The squeeze itself is pure shape bookkeeping done in the wrapper; the
    # kernel is a lane-dense identity copy of one (tr, cols) tile.
    o_ref[...] = x_ref[...]


def _native_sublane(itemsize):
    # f32 -> 8, bf16/f16 -> 16, int8/fp8 -> 32 (packed rows travel together).
    return max(8, 32 // max(itemsize, 1))


def _pick_rows_per_block(rows, cols, itemsize, sublane):
    """Rows per block: ~_TARGET_BLOCK_BYTES, sublane-aligned, >=2 grid steps
    when possible, preferring a value that divides rows evenly."""
    if rows <= sublane:
        return rows  # full-extent rows block; layout rule satisfied.

    tr = max(_TARGET_BLOCK_BYTES // (cols * itemsize), sublane)
    tr = (tr // sublane) * sublane

    # Guarantee >= 2 grid steps when rows allow it (v7x: both TCs stream DMAs).
    if rows >= 2 * sublane:
        half = (rows // 2 // sublane) * sublane
        if half >= sublane:
            tr = min(tr, half)

    tr = min(tr, rows)
    tr = max(tr, sublane)

    # Prefer a tr that divides rows: avoids a masked partial tail block.
    if rows % tr != 0:
        for cand in range(tr, sublane - 1, -sublane):
            if rows % cand == 0:
                tr = cand
                break
    return tr


def _copy_2d_pallas(x2, donate=False):
    """Pallas identity copy of a 2D (rows, cols) array, tiled on rows."""
    rows, cols = x2.shape
    itemsize = jnp.dtype(x2.dtype).itemsize
    sublane = _native_sublane(itemsize)
    tr = _pick_rows_per_block(rows, cols, itemsize, sublane)

    grid = (pl.cdiv(rows, tr),)

    return pl.pallas_call(
        _copy_kernel,
        out_shape=jax.ShapeDtypeStruct((rows, cols), x2.dtype),
        grid=grid,
        in_specs=[pl.BlockSpec((tr, cols), lambda i: (i, 0))],
        out_specs=pl.BlockSpec((tr, cols), lambda i: (i, 0)),
        compiler_params=pltpu.CompilerParams(
            # Pure copy: every grid step independent -> shard across both TCs
            # on v7x; harmless on single-TC v5e/v6e.
            dimension_semantics=("parallel",),
            vmem_limit_bytes=_VMEM_LIMIT_BYTES),
        cost_estimate=pl.CostEstimate(
            flops=0, transcendentals=0,
            bytes_accessed=2 * rows * cols * itemsize),
        input_output_aliases=({0: 0} if donate else {}),
    )(x2)


def squeeze_pallas(x, dim, *, use_pallas_copy=False, donate=False,
                   min_bytes=_MIN_PALLAS_BYTES):
    """Equivalent of torch.squeeze(x, dim=dim).

    Default: metadata-only jnp.squeeze (zero HBM traffic — the right answer
    in production; fuse the reshape into the consumer's BlockSpec instead).
    Set use_pallas_copy=True to materialize the result via the Pallas
    identity-copy kernel (opt-in, for large lane-aligned tensors).
    """
    nd = x.ndim
    d = dim % nd

    # torch.squeeze(x, dim) is a no-op when that dim's size is not 1.
    if x.shape[d] != 1:
        return x

    out_shape = tuple(x.shape[i] for i in range(nd) if i != d)
    n = x.size
    itemsize = jnp.dtype(x.dtype).itemsize

    # Fast path (default), and fallbacks where the Pallas copy can't win:
    #   - empty tensors,
    #   - small tensors (launch + per-step overhead dwarfs the copy),
    #   - sizes with no 128-lane factorization (narrow cols would force
    #     masked partial stores at low lane utilization).
    if (not use_pallas_copy) or n == 0 or (n * itemsize) < min_bytes \
            or (n % _LANE) != 0:
        return jnp.squeeze(x, axis=d)

    # Lane-dense 2D view (rows, cols): cols = largest multiple-of-128 divisor
    # of n, capped at _MAX_COLS.
    cols = _LANE
    for k in range(_MAX_COLS // _LANE, 0, -1):
        if n % (_LANE * k) == 0:
            cols = _LANE * k
            break
    rows = n // cols

    # The reshapes below are metadata-only for a contiguous array; only the
    # (rows, cols) identity copy runs inside the Pallas kernel.
    x2 = x.reshape(rows, cols)
    y2 = _copy_2d_pallas(x2, donate=donate)
    return y2.reshape(out_shape)


if __name__ == "__main__":
    key = jax.random.PRNGKey(0)

    # Module under test: Squeeze(dim=1) applied to a (B, 1, H, W) tensor.
    x = jax.random.normal(key, (2, 1, 16, 32), dtype=jnp.float32)
    ref = jnp.squeeze(x, axis=1)

    # 1) Default fast path: metadata-only squeeze.
    y_fast = jax.block_until_ready(squeeze_pallas(x, dim=1))
    assert y_fast.shape == ref.shape and y_fast.dtype == ref.dtype
    assert jnp.array_equal(y_fast, ref), "fast-path mismatch vs jnp.squeeze"

    # 2) Explicit opt-in Pallas copy path (min_bytes=0 so the kernel actually
    #    runs at this small test shape).
    y_pal = jax.block_until_ready(
        squeeze_pallas(x, dim=1, use_pallas_copy=True, min_bytes=0))
    assert y_pal.shape == ref.shape and y_pal.dtype == ref.dtype
    assert jnp.array_equal(y_pal, ref), "pallas-path mismatch vs jnp.squeeze"

    # 3) Negative-dim handling (dim=-3 is the size-1 axis here).
    y_neg = jax.block_until_ready(
        squeeze_pallas(x, dim=-3, use_pallas_copy=True, min_bytes=0))
    assert jnp.array_equal(y_neg, ref)

    # 4) No-op case (dim size != 1): torch.squeeze returns the input unchanged.
    z = jax.block_until_ready(squeeze_pallas(x, dim=0))
    assert z.shape == x.shape and jnp.array_equal(z, x)

    print("KERNEL_OK")
</pallas_src>

<mosaic_0001>
module attributes {stable_mosaic.version = 11 : i64} {
  func.func @_copy_kernel(%arg0: i32, %arg1: memref<1x1024xf32, #tpu.memory_space<vmem>>, %arg2: memref<1x1024xf32, #tpu.memory_space<vmem>>) attributes {dimension_semantics = [#tpu.dimension_semantics<parallel>], iteration_bounds = array<i64: 1>, scalar_prefetch = 0 : i64, scratch_operands = 0 : i64, tpu.core_type = #tpu.core_type<tc>, window_params = [{transform_indices = @transform_0, window_bounds = array<i64: 1, 1024>}, {transform_indices = @transform_1, window_bounds = array<i64: 1, 1024>}]} {
    %c0 = arith.constant 0 : index
    %c0_0 = arith.constant 0 : index
    %0 = vector.load %arg1[%c0, %c0_0] : memref<1x1024xf32, #tpu.memory_space<vmem>>, vector<1x1024xf32>
    %c0_1 = arith.constant 0 : index
    %c0_2 = arith.constant 0 : index
    %1 = vector.load %arg2[%c0_1, %c0_2] : memref<1x1024xf32, #tpu.memory_space<vmem>>, vector<1x1024xf32>
    tpu.vector_store %arg2[%c0_1, %c0_2], %0 {strides = array<i32>} : memref<1x1024xf32, #tpu.memory_space<vmem>>, vector<1x1024xf32>,
    return
  }
  func.func @transform_0(%arg0: i32) -> (i32, i32) {
    %c0_i32 = arith.constant 0 : i32
    %c0_i32_0 = arith.constant 0 : i32
    return %arg0, %c0_i32 : i32, i32
  }
  func.func @transform_1(%arg0: i32) -> (i32, i32) {
    %c0_i32 = arith.constant 0 : i32
    %c0_i32_0 = arith.constant 0 : i32
    return %arg0, %c0_i32 : i32, i32
  }
}

</mosaic_0001>

<bundles_post_ra>
// kernel: tpu_custom_call.1
= control target key start
LH: loop header
LB: loop body
LE: loop exit
PB: predicated region body
PF: predicated region fallthrough
CT: control target
= control target key end

     0   :  { %6 = vsyncpa [#allocation3], 0  ;;  %s114_s0 = inlined_call_operand.hbm [shape: f32[1,1024], index: 0, kind: input, shape index: {}]   ;;  %s115_s1 = inlined_call_operand.hbm [shape: f32[1,1024], index: 1, kind: output, shape index: {}]  }
   0x1   :  { %7 = vsyncpa [#allocation4], 0  ;;  %s13_s8 = sshll.u32 %s114_s0, 4  ;;  %s96_s9 = smov [#allocation2]   ;;  %s14_s8 = int_to_ptr.hbm [resolvable:$true] %s13_s8 }
   0x2   :  { %s15_s10 = sshll.u32 %s96_s9, 4  ;;  %s16_s10 = int_to_ptr.vmem [resolvable:$true] %s15_s10 }
   0x3   :  { %18 = dma.hbm_to_vmem [thread:$0]  %s14_s8, 128, %s16_s10, [#allocation3]  }
   0x4   :  { %92 = dma.done.wait [#allocation3], 128  }
   0x5   :  { %93 = vsyncadd [#allocation3], 4294967168  ;;  %s97_s11 = smov [#allocation5]   ;;  %s32_s15 = sshll.u32 %s115_s1, 4  ;;  %v23_v0 = vld [vmem:[#allocation2] sm:$0xff]  ;;  %s33_s15 = int_to_ptr.hbm [resolvable:$true] %s32_s15 }
   0x6   :  { %s30_s12 = sshll.u32 %s97_s11, 4  ;;  %24 = vst [vmem:[#allocation5] sm:$0xff] %v23_v0  ;;  %s31_s12 = int_to_ptr.vmem [resolvable:$true] %s30_s12 }
   0x7   :  { %35 = dma.vmem_to_hbm [thread:$0]  %s31_s12, 128, %s33_s15, [#allocation4]  }
   0x8   :  { %94 = dma.done.wait [#allocation4], 128  }
   0x9   :  { %95 = vsyncadd [#allocation4], 4294967168 }
   0xa   :  { %40 = vsyncpa [#allocation3], 1 }
   0xb   :  { %41 = vsyncpa [#allocation4], 1 }

</bundles_post_ra>
